<compile_context>
chip_gen: v5e
topology: v5e:2x2
jax: 0.10.0
libtpu: 0.0.40
codegen_flags: <defaults>
</compile_context>

<pallas_src>
import functools

import jax
import jax.numpy as jnp
from jax.experimental import pallas as pl
from jax.experimental.pallas import tpu as pltpu


LN_EPS = 1e-5                               # torch.nn.LayerNorm default
_VMEM_BUDGET = 48 * 1024 * 1024             # safe scoped-VMEM target (v7x: 64 MiB/TC)
_RESIDENT_WEIGHT_BUDGET = 16 * 1024 * 1024  # keep weights VMEM-resident if they fit


def _round_up(x, m):
    return (x + m - 1) // m * m


def _layernorm(x, gamma, beta):
    mu = jnp.mean(x, axis=-1, keepdims=True)
    var = jnp.mean(jnp.square(x - mu), axis=-1, keepdims=True)
    return (x - mu) * jax.lax.rsqrt(var + LN_EPS) * gamma + beta


def _block_body(q, k, v, w1, b1, w2, b2, g1, be1, g2, be2):
    """One transformer block on an f32 batch tile. q/k/v: (TB, S, D) f32."""
    TB, S, D = q.shape
    scale = D ** -0.5                       # fold 1/sqrt(D) into q (S*D mults)

    # --- scaled dot-product attention: bf16 operands -> MXU, f32 accumulate ---
    qb = (q * scale).astype(jnp.bfloat16)
    kb = k.astype(jnp.bfloat16)
    scores = jnp.einsum("bqd,bkd->bqk", qb, kb,
                        preferred_element_type=jnp.float32)        # (TB,S,S) f32
    scores = scores - jnp.max(scores, axis=-1, keepdims=True)
    p = jnp.exp(scores)
    p = p / jnp.sum(p, axis=-1, keepdims=True)      # exact divide (torch parity)
    attn = jnp.einsum("bqk,bkd->bqd", p.astype(jnp.bfloat16),
                      v.astype(jnp.bfloat16),
                      preferred_element_type=jnp.float32)          # (TB,S,D) f32
    # TODO(synk): for long sequences, tile KV with an online softmax so the
    # O(S^2) scores/p intermediates stay within VMEM (flash-style inner loop).

    # --- residual + LayerNorm 1 (f32 elementwise; v5e has no bf16 VPU/EUP) ---
    x = _layernorm(attn + q, g1, be1)                              # (TB,S,D)

    # --- FFN: rows merged to (TB*S, D) to fill the MXU; bf16 operands ---
    x2 = x.reshape(TB * S, D)               # free sublane merge (S % 8 == 0)
    h = jnp.dot(x2.astype(jnp.bfloat16), w1,
                preferred_element_type=jnp.float32) + b1           # (TB*S, E)
    h = jnp.maximum(h, 0.0)
    f = jnp.dot(h.astype(jnp.bfloat16), w2,
                preferred_element_type=jnp.float32) + b2           # (TB*S, D)
    f = f.reshape(TB, S, D)

    # --- residual + LayerNorm 2 ---
    return _layernorm(f + x, g2, be2)


def fused_blocks_kernel(q_ref, k_ref, v_ref, w1_ref, w2_ref, vec_ref,
                        o_ref, x_ref, *, weights_resident):
    # grid = (batch_tiles, num_blocks); block axis innermost ("arbitrary").
    blk = pl.program_id(1)
    nb = pl.num_programs(1)

    D = w1_ref.shape[-2]
    E = w1_ref.shape[-1]
    widx = blk if weights_resident else 0
    w1 = w1_ref[widx]                  # (D, E) bf16
    w2 = w2_ref[widx]                  # (E, D) bf16
    vec = vec_ref[widx]                # (6, P) f32 packed small params
    b1 = vec[0:1, :E]
    b2 = vec[1:2, :D]
    g1 = vec[2:3, :D]
    be1 = vec[3:4, :D]
    g2 = vec[4:5, :D]
    be2 = vec[5:6, :D]

    @pl.when(blk == 0)
    def _first_block():
        q = q_ref[...].astype(jnp.float32)
        k = k_ref[...].astype(jnp.float32)
        v = v_ref[...].astype(jnp.float32)
        x_ref[...] = _block_body(q, k, v, w1, b1, w2, b2, g1, be1, g2, be2)

    @pl.when(blk > 0)
    def _later_blocks():
        x = x_ref[...]  # f32-resident activation from the previous block
        x_ref[...] = _block_body(x, x, x, w1, b1, w2, b2, g1, be1, g2, be2)

    @pl.when(blk == nb - 1)
    def _finalize():
        o_ref[...] = x_ref[...].astype(o_ref.dtype)


def _vmem_estimate(TB, S, D, E, P, NB, in_bytes, weights_resident):
    """Rough VMEM usage (bytes) for a given batch tile."""
    x_scratch = TB * S * D * 4
    pipe = 4 * 2 * TB * S * D * in_bytes                 # Q,K,V,out double buffers
    w_per_block = 2 * D * E * 2 + 6 * P * 4              # bf16 weights + f32 vecs
    w = NB * w_per_block if weights_resident else 2 * w_per_block
    inter = (TB * S * S * (4 + 2)                        # scores f32 + p bf16
             + 3 * TB * S * D * 4                        # attn, x, f (f32)
             + TB * S * E * (4 + 2))                     # h f32 + bf16 copy
    return x_scratch + pipe + w + int(1.25 * inter)


def _choose_batch_tile(B, S, D, E, P, NB, in_bytes, weights_resident):
    divisors = [t for t in range(B, 0, -1) if B % t == 0]
    # Prefer >= 2 batch tiles: the "parallel" batch grid axis is what shards
    # work across v7x's two TensorCores (no effect on single-TC v5e/v6e).
    preferred = [t for t in divisors if B // t >= 2] or divisors
    for t in preferred:
        if _vmem_estimate(t, S, D, E, P, NB, in_bytes,
                          weights_resident) <= _VMEM_BUDGET:
            return t
    return preferred[-1]


@functools.partial(jax.jit, static_argnames=("block_batch",))
def sequential_blocks_forward(Q, K, V, packed_params, block_batch=None):
    """Run the whole chain of blocks in one fused pallas_call."""
    B, S, D = Q.shape
    w1, w2, vecs = packed_params
    NB = w1.shape[0]
    E = w1.shape[2]
    P = vecs.shape[-1]
    assert S % 8 == 0, "seq length must be a multiple of 8 (free sublane merge)"

    in_bytes = jnp.dtype(Q.dtype).itemsize
    resident_bytes = NB * (2 * D * E * 2 + 6 * P * 4)
    weights_resident = resident_bytes <= _RESIDENT_WEIGHT_BUDGET

    TB = (_choose_batch_tile(B, S, D, E, P, NB, in_bytes, weights_resident)
          if block_batch is None else block_batch)
    assert B % TB == 0, "batch must be divisible by the batch tile"

    est = _vmem_estimate(TB, S, D, E, P, NB, in_bytes, weights_resident)
    vmem_limit = int(min(max(est + (8 << 20), _VMEM_BUDGET), 112 << 20))

    seq_spec = pl.BlockSpec((TB, S, D), lambda i, b: (i, 0, 0))

    if weights_resident:
        # Whole stacked weight tensors stay in VMEM for the entire grid
        # (constant index_map -> a single DMA); kernel indexes w_ref[blk].
        w1_spec = pl.BlockSpec((NB, D, E), lambda i, b: (0, 0, 0))
        w2_spec = pl.BlockSpec((NB, E, D), lambda i, b: (0, 0, 0))
        vec_spec = pl.BlockSpec((NB, 6, P), lambda i, b: (0, 0, 0))
    else:
        # Stream one block's weights per grid step along the block axis.
        w1_spec = pl.BlockSpec((1, D, E), lambda i, b: (b, 0, 0))
        w2_spec = pl.BlockSpec((1, E, D), lambda i, b: (b, 0, 0))
        vec_spec = pl.BlockSpec((1, 6, P), lambda i, b: (b, 0, 0))

    kernel = functools.partial(fused_blocks_kernel,
                               weights_resident=weights_resident)

    return pl.pallas_call(
        kernel,
        out_shape=jax.ShapeDtypeStruct((B, S, D), Q.dtype),
        grid=(B // TB, NB),
        in_specs=[seq_spec, seq_spec, seq_spec, w1_spec, w2_spec, vec_spec],
        out_specs=seq_spec,
        scratch_shapes=[pltpu.VMEM((TB, S, D), jnp.float32)],  # resident x (f32)
        compiler_params=pltpu.CompilerParams(
            dimension_semantics=("parallel", "arbitrary"),
            vmem_limit_bytes=vmem_limit),
    )(Q, K, V, w1, w2, vecs)


def init_block_params(key, vdim, forward_expansion):
    """Deterministic params for one block (PyTorch-like uniform init)."""
    e = forward_expansion * vdim
    k1, k2, k3, k4 = jax.random.split(key, 4)
    lim1 = 1.0 / jnp.sqrt(jnp.float32(vdim))
    lim2 = 1.0 / jnp.sqrt(jnp.float32(e))
    # nn.Linear(vdim, e): weight (e, vdim) -> store transposed (vdim, e)
    w1 = jax.random.uniform(k1, (vdim, e), jnp.float32, -lim1, lim1)
    b1 = jax.random.uniform(k2, (e,), jnp.float32, -lim1, lim1)
    # nn.Linear(e, vdim): weight (vdim, e) -> store transposed (e, vdim)
    w2 = jax.random.uniform(k3, (e, vdim), jnp.float32, -lim2, lim2)
    b2 = jax.random.uniform(k4, (vdim,), jnp.float32, -lim2, lim2)
    g1 = jnp.ones((vdim,), jnp.float32)
    be1 = jnp.zeros((vdim,), jnp.float32)
    g2 = jnp.ones((vdim,), jnp.float32)
    be2 = jnp.zeros((vdim,), jnp.float32)
    return (w1, b1, w2, b2, g1, be1, g2, be2)


def pack_block_params(block_params_list):
    """Pack per-block params for the fused kernel.

    Returns (W1: (NB, D, E) bf16, W2: (NB, E, D) bf16, vecs: (NB, 6, P) f32)
    where vecs rows are [b1, b2, ln1_gamma, ln1_beta, ln2_gamma, ln2_beta]
    zero-padded to a lane-friendly length P.
    """
    D, E = block_params_list[0][0].shape
    P = _round_up(max(D, E), 128)

    w1 = jnp.stack([bp[0] for bp in block_params_list]).astype(jnp.bfloat16)
    w2 = jnp.stack([bp[2] for bp in block_params_list]).astype(jnp.bfloat16)

    def pad(v):
        v = v.reshape(-1)
        return jnp.pad(v, (0, P - v.shape[0]))

    vec_blocks = []
    for (_, b1, _, b2, g1, be1, g2, be2) in block_params_list:
        vec_blocks.append(jnp.stack(
            [pad(b1), pad(b2), pad(g1), pad(be1), pad(g2), pad(be2)], axis=0))
    vecs = jnp.stack(vec_blocks, axis=0).astype(jnp.float32)
    return (w1, w2, vecs)


def reference_forward(Q, K, V, block_params_list):
    """Pure-JAX f32 reference for validation."""
    def one_block(q, k, v, params):
        w1, b1, w2, b2, g1, be1, g2, be2 = params
        d = q.shape[-1]
        s = jnp.einsum("bqd,bkd->bqk", q, k) / jnp.sqrt(jnp.float32(d))
        p = jax.nn.softmax(s, axis=-1)
        attn = jnp.einsum("bqk,bkd->bqd", p, v)
        x = _layernorm(attn + q, g1, be1)
        h = jnp.maximum(x @ w1 + b1, 0.0)
        f = h @ w2 + b2
        return _layernorm(f + x, g2, be2)

    x = one_block(Q, K, V, block_params_list[0])
    for params in block_params_list[1:]:
        x = one_block(x, x, x, params)
    return x


if __name__ == "__main__":
    B, S, D = 2, 8, 32
    FORWARD_EXPANSION = 4
    NUM_BLOCKS = 2

    root = jax.random.PRNGKey(0)
    kq, kk, kv, kp = jax.random.split(root, 4)
    Q = jax.random.normal(kq, (B, S, D), jnp.float32)
    K = jax.random.normal(kk, (B, S, D), jnp.float32)
    V = jax.random.normal(kv, (B, S, D), jnp.float32)

    block_keys = jax.random.split(kp, NUM_BLOCKS)
    block_params_list = [init_block_params(k, D, FORWARD_EXPANSION)
                         for k in block_keys]
    packed_params = pack_block_params(block_params_list)

    out = sequential_blocks_forward(Q, K, V, packed_params)
    out = jax.block_until_ready(out)

    # Reference uses the same bf16-stored weights (rounded back to f32) so the
    # check isolates kernel math; the remaining error is bf16 MXU-operand
    # rounding on the activations (structural bugs would be O(1)).
    ref_params = []
    for (w1, b1, w2, b2, g1, be1, g2, be2) in block_params_list:
        ref_params.append((w1.astype(jnp.bfloat16).astype(jnp.float32), b1,
                           w2.astype(jnp.bfloat16).astype(jnp.float32), b2,
                           g1, be1, g2, be2))
    ref = reference_forward(Q, K, V, ref_params)

    assert out.shape == (B, S, D)
    max_err = float(jnp.max(jnp.abs(out - ref)))
    assert max_err < 5e-2, f"mismatch vs reference: max abs err {max_err}"

    print("KERNEL_OK")
</pallas_src>

<mosaic_0001>
module attributes {stable_mosaic.version = 11 : i64} {
  func.func @fused_blocks_kernel(%arg0: i32, %arg1: i32, %arg2: memref<1x8x32xf32, #tpu.memory_space<vmem>>, %arg3: memref<1x8x32xf32, #tpu.memory_space<vmem>>, %arg4: memref<1x8x32xf32, #tpu.memory_space<vmem>>, %arg5: memref<2x32x128xbf16, #tpu.memory_space<vmem>>, %arg6: memref<2x128x32xbf16, #tpu.memory_space<vmem>>, %arg7: memref<2x6x128xf32, #tpu.memory_space<vmem>>, %arg8: memref<1x8x32xf32, #tpu.memory_space<vmem>>, %arg9: memref<1x8x32xf32, #tpu.memory_space<vmem>>) attributes {dimension_semantics = [#tpu.dimension_semantics<parallel>, #tpu.dimension_semantics<arbitrary>], iteration_bounds = array<i64: 2, 2>, scalar_prefetch = 0 : i64, scratch_operands = 1 : i64, tpu.core_type = #tpu.core_type<tc>, window_params = [{transform_indices = @transform_0, window_bounds = array<i64: 1, 8, 32>}, {transform_indices = @transform_1, window_bounds = array<i64: 1, 8, 32>}, {transform_indices = @transform_2, window_bounds = array<i64: 1, 8, 32>}, {pipeline_mode = #tpu.pipeline_mode<synchronous>, transform_indices = @transform_3, window_bounds = array<i64: 2, 32, 128>}, {pipeline_mode = #tpu.pipeline_mode<synchronous>, transform_indices = @transform_4, window_bounds = array<i64: 2, 128, 32>}, {pipeline_mode = #tpu.pipeline_mode<synchronous>, transform_indices = @transform_5, window_bounds = array<i64: 2, 6, 128>}, {transform_indices = @transform_6, window_bounds = array<i64: 1, 8, 32>}]} {
    %0 = arith.index_cast %arg1 : i32 to index
    %c0 = arith.constant 0 : index
    %c0_0 = arith.constant 0 : index
    %1 = vector.load %arg5[%0, %c0, %c0_0] : memref<2x32x128xbf16, #tpu.memory_space<vmem>>, vector<1x32x128xbf16>
    %2 = vector.shape_cast %1 : vector<1x32x128xbf16> to vector<32x128xbf16>
    %3 = arith.index_cast %arg1 : i32 to index
    %c0_1 = arith.constant 0 : index
    %c0_2 = arith.constant 0 : index
    %4 = vector.load %arg6[%3, %c0_1, %c0_2] : memref<2x128x32xbf16, #tpu.memory_space<vmem>>, vector<1x128x32xbf16>
    %5 = vector.shape_cast %4 : vector<1x128x32xbf16> to vector<128x32xbf16>
    %6 = arith.index_cast %arg1 : i32 to index
    %c0_3 = arith.constant 0 : index
    %c0_4 = arith.constant 0 : index
    %7 = vector.load %arg7[%6, %c0_3, %c0_4] : memref<2x6x128xf32, #tpu.memory_space<vmem>>, vector<1x6x128xf32>
    %8 = vector.shape_cast %7 : vector<1x6x128xf32> to vector<6x128xf32>
    %9 = vector.extract_strided_slice %8 {offsets = [0, 0], sizes = [1, 128], strides = [1, 1]} : vector<6x128xf32> to vector<1x128xf32>
    %10 = vector.extract_strided_slice %8 {offsets = [1, 0], sizes = [1, 32], strides = [1, 1]} : vector<6x128xf32> to vector<1x32xf32>
    %11 = vector.extract_strided_slice %8 {offsets = [2, 0], sizes = [1, 32], strides = [1, 1]} : vector<6x128xf32> to vector<1x32xf32>
    %12 = vector.extract_strided_slice %8 {offsets = [3, 0], sizes = [1, 32], strides = [1, 1]} : vector<6x128xf32> to vector<1x32xf32>
    %13 = vector.extract_strided_slice %8 {offsets = [4, 0], sizes = [1, 32], strides = [1, 1]} : vector<6x128xf32> to vector<1x32xf32>
    %14 = vector.extract_strided_slice %8 {offsets = [5, 0], sizes = [1, 32], strides = [1, 1]} : vector<6x128xf32> to vector<1x32xf32>
    %c0_i32 = arith.constant 0 : i32
    %15 = arith.cmpi eq, %arg1, %c0_i32 : i32
    %16 = arith.extui %15 : i1 to i32
    %c0_i32_5 = arith.constant 0 : i32
    %17 = arith.cmpi ne, %16, %c0_i32_5 : i32
    scf.if %17 {
      %c0_9 = arith.constant 0 : index
      %c0_10 = arith.constant 0 : index
      %c0_11 = arith.constant 0 : index
      %24 = vector.load %arg2[%c0_9, %c0_10, %c0_11] : memref<1x8x32xf32, #tpu.memory_space<vmem>>, vector<1x8x32xf32>
      %c0_12 = arith.constant 0 : index
      %c0_13 = arith.constant 0 : index
      %c0_14 = arith.constant 0 : index
      %25 = vector.load %arg3[%c0_12, %c0_13, %c0_14] : memref<1x8x32xf32, #tpu.memory_space<vmem>>, vector<1x8x32xf32>
      %c0_15 = arith.constant 0 : index
      %c0_16 = arith.constant 0 : index
      %c0_17 = arith.constant 0 : index
      %26 = vector.load %arg4[%c0_15, %c0_16, %c0_17] : memref<1x8x32xf32, #tpu.memory_space<vmem>>, vector<1x8x32xf32>
      %cst = arith.constant 0.176776692 : f32
      %27 = vector.broadcast %cst : f32 to vector<1x8x32xf32>
      %28 = arith.mulf %24, %27 : vector<1x8x32xf32>
      %29 = arith.truncf %28 : vector<1x8x32xf32> to vector<1x8x32xbf16>
      %30 = arith.truncf %25 : vector<1x8x32xf32> to vector<1x8x32xbf16>
      "tpu.trace_start"() <{level = 10 : i32, message = "bqd,bkd->bqk"}> : () -> ()
      %cst_18 = arith.constant dense<0.000000e+00> : vector<1x8x8xf32>
      %31 = tpu.matmul %29, %30, %cst_18 {dimension_numbers = #tpu.dot_dimension_numbers<[2], [2], [1], [1], [0, 0, 0, 1, 1, 1], [0], [0]>} : vector<1x8x32xbf16>, vector<1x8x32xbf16>, vector<1x8x8xf32> -> vector<1x8x8xf32>
      "tpu.trace_stop"() : () -> ()
      %cst_19 = arith.constant dense<0xFF800000> : vector<1x8xf32>
      %32 = vector.multi_reduction <maximumf>, %31, %cst_19 [2] : vector<1x8x8xf32> to vector<1x8xf32>
      %33 = vector.shape_cast %32 : vector<1x8xf32> to vector<1x8x1xf32>
      %34 = vector.broadcast %33 : vector<1x8x1xf32> to vector<1x8x8xf32>
      %35 = arith.subf %31, %34 : vector<1x8x8xf32>
      %36 = math.exp %35 : vector<1x8x8xf32>
      %cst_20 = arith.constant dense<0.000000e+00> : vector<1x8xf32>
      %37 = vector.multi_reduction <add>, %36, %cst_20 [2] : vector<1x8x8xf32> to vector<1x8xf32>
      %38 = vector.shape_cast %37 : vector<1x8xf32> to vector<1x8x1xf32>
      %39 = vector.broadcast %38 : vector<1x8x1xf32> to vector<1x8x8xf32>
      %40 = arith.divf %36, %39 : vector<1x8x8xf32>
      %41 = arith.truncf %40 : vector<1x8x8xf32> to vector<1x8x8xbf16>
      %42 = arith.truncf %26 : vector<1x8x32xf32> to vector<1x8x32xbf16>
      "tpu.trace_start"() <{level = 10 : i32, message = "bqk,bkd->bqd"}> : () -> ()
      %cst_21 = arith.constant dense<0.000000e+00> : vector<1x8x32xf32>
      %43 = tpu.matmul %41, %42, %cst_21 {dimension_numbers = #tpu.dot_dimension_numbers<[2], [1], [1], [2], [0, 0, 0, 1, 1, 2], [0], [0]>} : vector<1x8x8xbf16>, vector<1x8x32xbf16>, vector<1x8x32xf32> -> vector<1x8x32xf32>
      "tpu.trace_stop"() : () -> ()
      %44 = arith.addf %43, %24 : vector<1x8x32xf32>
      %cst_22 = arith.constant dense<0.000000e+00> : vector<1x8xf32>
      %45 = vector.multi_reduction <add>, %44, %cst_22 [2] : vector<1x8x32xf32> to vector<1x8xf32>
      %46 = vector.shape_cast %45 : vector<1x8xf32> to vector<1x8x1xf32>
      %cst_23 = arith.constant 3.200000e+01 : f32
      %47 = vector.broadcast %cst_23 : f32 to vector<1x8x1xf32>
      %48 = arith.divf %46, %47 : vector<1x8x1xf32>
      %49 = vector.broadcast %48 : vector<1x8x1xf32> to vector<1x8x32xf32>
      %50 = arith.subf %44, %49 : vector<1x8x32xf32>
      %51 = arith.mulf %50, %50 : vector<1x8x32xf32>
      %cst_24 = arith.constant dense<0.000000e+00> : vector<1x8xf32>
      %52 = vector.multi_reduction <add>, %51, %cst_24 [2] : vector<1x8x32xf32> to vector<1x8xf32>
      %53 = vector.shape_cast %52 : vector<1x8xf32> to vector<1x8x1xf32>
      %cst_25 = arith.constant 3.200000e+01 : f32
      %54 = vector.broadcast %cst_25 : f32 to vector<1x8x1xf32>
      %55 = arith.divf %53, %54 : vector<1x8x1xf32>
      %56 = vector.broadcast %48 : vector<1x8x1xf32> to vector<1x8x32xf32>
      %57 = arith.subf %44, %56 : vector<1x8x32xf32>
      %cst_26 = arith.constant 9.99999974E-6 : f32
      %58 = vector.broadcast %cst_26 : f32 to vector<1x8x1xf32>
      %59 = arith.addf %55, %58 : vector<1x8x1xf32>
      %60 = math.rsqrt %59 : vector<1x8x1xf32>
      %61 = vector.broadcast %60 : vector<1x8x1xf32> to vector<1x8x32xf32>
      %62 = arith.mulf %57, %61 : vector<1x8x32xf32>
      %63 = vector.shape_cast %11 : vector<1x32xf32> to vector<1x1x32xf32>
      %64 = vector.broadcast %63 : vector<1x1x32xf32> to vector<1x8x32xf32>
      %65 = arith.mulf %62, %64 : vector<1x8x32xf32>
      %66 = vector.shape_cast %12 : vector<1x32xf32> to vector<1x1x32xf32>
      %67 = vector.broadcast %66 : vector<1x1x32xf32> to vector<1x8x32xf32>
      %68 = arith.addf %65, %67 : vector<1x8x32xf32>
      %69 = vector.shape_cast %68 : vector<1x8x32xf32> to vector<8x32xf32>
      %70 = arith.truncf %69 : vector<8x32xf32> to vector<8x32xbf16>
      %cst_27 = arith.constant dense<0.000000e+00> : vector<8x128xf32>
      %71 = tpu.matmul %70, %2, %cst_27 {dimension_numbers = #tpu.dot_dimension_numbers<[1], [0], [0], [1], [0, 0, 1, 1], [], []>} : vector<8x32xbf16>, vector<32x128xbf16>, vector<8x128xf32> -> vector<8x128xf32>
      %72 = vector.broadcast %9 : vector<1x128xf32> to vector<8x128xf32>
      %73 = arith.addf %71, %72 : vector<8x128xf32>
      %cst_28 = arith.constant 0.000000e+00 : f32
      %74 = vector.broadcast %cst_28 : f32 to vector<8x128xf32>
      %75 = arith.maximumf %73, %74 : vector<8x128xf32>
      %76 = arith.truncf %75 : vector<8x128xf32> to vector<8x128xbf16>
      %cst_29 = arith.constant dense<0.000000e+00> : vector<8x32xf32>
      %77 = tpu.matmul %76, %5, %cst_29 {dimension_numbers = #tpu.dot_dimension_numbers<[1], [0], [0], [1], [0, 0, 1, 1], [], []>} : vector<8x128xbf16>, vector<128x32xbf16>, vector<8x32xf32> -> vector<8x32xf32>
      %78 = vector.broadcast %10 : vector<1x32xf32> to vector<8x32xf32>
      %79 = arith.addf %77, %78 : vector<8x32xf32>
      %80 = vector.shape_cast %79 : vector<8x32xf32> to vector<1x8x32xf32>
      %81 = arith.addf %80, %68 : vector<1x8x32xf32>
      %cst_30 = arith.constant dense<0.000000e+00> : vector<1x8xf32>
      %82 = vector.multi_reduction <add>, %81, %cst_30 [2] : vector<1x8x32xf32> to vector<1x8xf32>
      %83 = vector.shape_cast %82 : vector<1x8xf32> to vector<1x8x1xf32>
      %cst_31 = arith.constant 3.200000e+01 : f32
      %84 = vector.broadcast %cst_31 : f32 to vector<1x8x1xf32>
      %85 = arith.divf %83, %84 : vector<1x8x1xf32>
      %86 = vector.broadcast %85 : vector<1x8x1xf32> to vector<1x8x32xf32>
      %87 = arith.subf %81, %86 : vector<1x8x32xf32>
      %88 = arith.mulf %87, %87 : vector<1x8x32xf32>
      %cst_32 = arith.constant dense<0.000000e+00> : vector<1x8xf32>
      %89 = vector.multi_reduction <add>, %88, %cst_32 [2] : vector<1x8x32xf32> to vector<1x8xf32>
      %90 = vector.shape_cast %89 : vector<1x8xf32> to vector<1x8x1xf32>
      %cst_33 = arith.constant 3.200000e+01 : f32
      %91 = vector.broadcast %cst_33 : f32 to vector<1x8x1xf32>
      %92 = arith.divf %90, %91 : vector<1x8x1xf32>
      %93 = vector.broadcast %85 : vector<1x8x1xf32> to vector<1x8x32xf32>
      %94 = arith.subf %81, %93 : vector<1x8x32xf32>
      %cst_34 = arith.constant 9.99999974E-6 : f32
      %95 = vector.broadcast %cst_34 : f32 to vector<1x8x1xf32>
      %96 = arith.addf %92, %95 : vector<1x8x1xf32>
      %97 = math.rsqrt %96 : vector<1x8x1xf32>
      %98 = vector.broadcast %97 : vector<1x8x1xf32> to vector<1x8x32xf32>
      %99 = arith.mulf %94, %98 : vector<1x8x32xf32>
      %100 = vector.shape_cast %13 : vector<1x32xf32> to vector<1x1x32xf32>
      %101 = vector.broadcast %100 : vector<1x1x32xf32> to vector<1x8x32xf32>
      %102 = arith.mulf %99, %101 : vector<1x8x32xf32>
      %103 = vector.shape_cast %14 : vector<1x32xf32> to vector<1x1x32xf32>
      %104 = vector.broadcast %103 : vector<1x1x32xf32> to vector<1x8x32xf32>
      %105 = arith.addf %102, %104 : vector<1x8x32xf32>
      %c0_35 = arith.constant 0 : index
      %c0_36 = arith.constant 0 : index
      %c0_37 = arith.constant 0 : index
      %106 = vector.load %arg9[%c0_35, %c0_36, %c0_37] : memref<1x8x32xf32, #tpu.memory_space<vmem>>, vector<1x8x32xf32>
      tpu.vector_store %arg9[%c0_35, %c0_36, %c0_37], %105 {strides = array<i32>} : memref<1x8x32xf32, #tpu.memory_space<vmem>>, vector<1x8x32xf32>,
    } else {
    }
    %c0_i32_6 = arith.constant 0 : i32
    %18 = arith.cmpi sgt, %arg1, %c0_i32_6 : i32
    %19 = arith.extui %18 : i1 to i32
    %c0_i32_7 = arith.constant 0 : i32
    %20 = arith.cmpi ne, %19, %c0_i32_7 : i32
    scf.if %20 {
      %c0_9 = arith.constant 0 : index
      %c0_10 = arith.constant 0 : index
      %c0_11 = arith.constant 0 : index
      %24 = vector.load %arg9[%c0_9, %c0_10, %c0_11] : memref<1x8x32xf32, #tpu.memory_space<vmem>>, vector<1x8x32xf32>
      %cst = arith.constant 0.176776692 : f32
      %25 = vector.broadcast %cst : f32 to vector<1x8x32xf32>
      %26 = arith.mulf %24, %25 : vector<1x8x32xf32>
      %27 = arith.truncf %26 : vector<1x8x32xf32> to vector<1x8x32xbf16>
      %28 = arith.truncf %24 : vector<1x8x32xf32> to vector<1x8x32xbf16>
      "tpu.trace_start"() <{level = 10 : i32, message = "bqd,bkd->bqk"}> : () -> ()
      %cst_12 = arith.constant dense<0.000000e+00> : vector<1x8x8xf32>
      %29 = tpu.matmul %27, %28, %cst_12 {dimension_numbers = #tpu.dot_dimension_numbers<[2], [2], [1], [1], [0, 0, 0, 1, 1, 1], [0], [0]>} : vector<1x8x32xbf16>, vector<1x8x32xbf16>, vector<1x8x8xf32> -> vector<1x8x8xf32>
      "tpu.trace_stop"() : () -> ()
      %cst_13 = arith.constant dense<0xFF800000> : vector<1x8xf32>
      %30 = vector.multi_reduction <maximumf>, %29, %cst_13 [2] : vector<1x8x8xf32> to vector<1x8xf32>
      %31 = vector.shape_cast %30 : vector<1x8xf32> to vector<1x8x1xf32>
      %32 = vector.broadcast %31 : vector<1x8x1xf32> to vector<1x8x8xf32>
      %33 = arith.subf %29, %32 : vector<1x8x8xf32>
      %34 = math.exp %33 : vector<1x8x8xf32>
      %cst_14 = arith.constant dense<0.000000e+00> : vector<1x8xf32>
      %35 = vector.multi_reduction <add>, %34, %cst_14 [2] : vector<1x8x8xf32> to vector<1x8xf32>
      %36 = vector.shape_cast %35 : vector<1x8xf32> to vector<1x8x1xf32>
      %37 = vector.broadcast %36 : vector<1x8x1xf32> to vector<1x8x8xf32>
      %38 = arith.divf %34, %37 : vector<1x8x8xf32>
      %39 = arith.truncf %38 : vector<1x8x8xf32> to vector<1x8x8xbf16>
      %40 = arith.truncf %24 : vector<1x8x32xf32> to vector<1x8x32xbf16>
      "tpu.trace_start"() <{level = 10 : i32, message = "bqk,bkd->bqd"}> : () -> ()
      %cst_15 = arith.constant dense<0.000000e+00> : vector<1x8x32xf32>
      %41 = tpu.matmul %39, %40, %cst_15 {dimension_numbers = #tpu.dot_dimension_numbers<[2], [1], [1], [2], [0, 0, 0, 1, 1, 2], [0], [0]>} : vector<1x8x8xbf16>, vector<1x8x32xbf16>, vector<1x8x32xf32> -> vector<1x8x32xf32>
      "tpu.trace_stop"() : () -> ()
      %42 = arith.addf %41, %24 : vector<1x8x32xf32>
      %cst_16 = arith.constant dense<0.000000e+00> : vector<1x8xf32>
      %43 = vector.multi_reduction <add>, %42, %cst_16 [2] : vector<1x8x32xf32> to vector<1x8xf32>
      %44 = vector.shape_cast %43 : vector<1x8xf32> to vector<1x8x1xf32>
      %cst_17 = arith.constant 3.200000e+01 : f32
      %45 = vector.broadcast %cst_17 : f32 to vector<1x8x1xf32>
      %46 = arith.divf %44, %45 : vector<1x8x1xf32>
      %47 = vector.broadcast %46 : vector<1x8x1xf32> to vector<1x8x32xf32>
      %48 = arith.subf %42, %47 : vector<1x8x32xf32>
      %49 = arith.mulf %48, %48 : vector<1x8x32xf32>
      %cst_18 = arith.constant dense<0.000000e+00> : vector<1x8xf32>
      %50 = vector.multi_reduction <add>, %49, %cst_18 [2] : vector<1x8x32xf32> to vector<1x8xf32>
      %51 = vector.shape_cast %50 : vector<1x8xf32> to vector<1x8x1xf32>
      %cst_19 = arith.constant 3.200000e+01 : f32
      %52 = vector.broadcast %cst_19 : f32 to vector<1x8x1xf32>
      %53 = arith.divf %51, %52 : vector<1x8x1xf32>
      %54 = vector.broadcast %46 : vector<1x8x1xf32> to vector<1x8x32xf32>
      %55 = arith.subf %42, %54 : vector<1x8x32xf32>
      %cst_20 = arith.constant 9.99999974E-6 : f32
      %56 = vector.broadcast %cst_20 : f32 to vector<1x8x1xf32>
      %57 = arith.addf %53, %56 : vector<1x8x1xf32>
      %58 = math.rsqrt %57 : vector<1x8x1xf32>
      %59 = vector.broadcast %58 : vector<1x8x1xf32> to vector<1x8x32xf32>
      %60 = arith.mulf %55, %59 : vector<1x8x32xf32>
      %61 = vector.shape_cast %11 : vector<1x32xf32> to vector<1x1x32xf32>
      %62 = vector.broadcast %61 : vector<1x1x32xf32> to vector<1x8x32xf32>
      %63 = arith.mulf %60, %62 : vector<1x8x32xf32>
      %64 = vector.shape_cast %12 : vector<1x32xf32> to vector<1x1x32xf32>
      %65 = vector.broadcast %64 : vector<1x1x32xf32> to vector<1x8x32xf32>
      %66 = arith.addf %63, %65 : vector<1x8x32xf32>
      %67 = vector.shape_cast %66 : vector<1x8x32xf32> to vector<8x32xf32>
      %68 = arith.truncf %67 : vector<8x32xf32> to vector<8x32xbf16>
      %cst_21 = arith.constant dense<0.000000e+00> : vector<8x128xf32>
      %69 = tpu.matmul %68, %2, %cst_21 {dimension_numbers = #tpu.dot_dimension_numbers<[1], [0], [0], [1], [0, 0, 1, 1], [], []>} : vector<8x32xbf16>, vector<32x128xbf16>, vector<8x128xf32> -> vector<8x128xf32>
      %70 = vector.broadcast %9 : vector<1x128xf32> to vector<8x128xf32>
      %71 = arith.addf %69, %70 : vector<8x128xf32>
      %cst_22 = arith.constant 0.000000e+00 : f32
      %72 = vector.broadcast %cst_22 : f32 to vector<8x128xf32>
      %73 = arith.maximumf %71, %72 : vector<8x128xf32>
      %74 = arith.truncf %73 : vector<8x128xf32> to vector<8x128xbf16>
      %cst_23 = arith.constant dense<0.000000e+00> : vector<8x32xf32>
      %75 = tpu.matmul %74, %5, %cst_23 {dimension_numbers = #tpu.dot_dimension_numbers<[1], [0], [0], [1], [0, 0, 1, 1], [], []>} : vector<8x128xbf16>, vector<128x32xbf16>, vector<8x32xf32> -> vector<8x32xf32>
      %76 = vector.broadcast %10 : vector<1x32xf32> to vector<8x32xf32>
      %77 = arith.addf %75, %76 : vector<8x32xf32>
      %78 = vector.shape_cast %77 : vector<8x32xf32> to vector<1x8x32xf32>
      %79 = arith.addf %78, %66 : vector<1x8x32xf32>
      %cst_24 = arith.constant dense<0.000000e+00> : vector<1x8xf32>
      %80 = vector.multi_reduction <add>, %79, %cst_24 [2] : vector<1x8x32xf32> to vector<1x8xf32>
      %81 = vector.shape_cast %80 : vector<1x8xf32> to vector<1x8x1xf32>
      %cst_25 = arith.constant 3.200000e+01 : f32
      %82 = vector.broadcast %cst_25 : f32 to vector<1x8x1xf32>
      %83 = arith.divf %81, %82 : vector<1x8x1xf32>
      %84 = vector.broadcast %83 : vector<1x8x1xf32> to vector<1x8x32xf32>
      %85 = arith.subf %79, %84 : vector<1x8x32xf32>
      %86 = arith.mulf %85, %85 : vector<1x8x32xf32>
      %cst_26 = arith.constant dense<0.000000e+00> : vector<1x8xf32>
      %87 = vector.multi_reduction <add>, %86, %cst_26 [2] : vector<1x8x32xf32> to vector<1x8xf32>
      %88 = vector.shape_cast %87 : vector<1x8xf32> to vector<1x8x1xf32>
      %cst_27 = arith.constant 3.200000e+01 : f32
      %89 = vector.broadcast %cst_27 : f32 to vector<1x8x1xf32>
      %90 = arith.divf %88, %89 : vector<1x8x1xf32>
      %91 = vector.broadcast %83 : vector<1x8x1xf32> to vector<1x8x32xf32>
      %92 = arith.subf %79, %91 : vector<1x8x32xf32>
      %cst_28 = arith.constant 9.99999974E-6 : f32
      %93 = vector.broadcast %cst_28 : f32 to vector<1x8x1xf32>
      %94 = arith.addf %90, %93 : vector<1x8x1xf32>
      %95 = math.rsqrt %94 : vector<1x8x1xf32>
      %96 = vector.broadcast %95 : vector<1x8x1xf32> to vector<1x8x32xf32>
      %97 = arith.mulf %92, %96 : vector<1x8x32xf32>
      %98 = vector.shape_cast %13 : vector<1x32xf32> to vector<1x1x32xf32>
      %99 = vector.broadcast %98 : vector<1x1x32xf32> to vector<1x8x32xf32>
      %100 = arith.mulf %97, %99 : vector<1x8x32xf32>
      %101 = vector.shape_cast %14 : vector<1x32xf32> to vector<1x1x32xf32>
      %102 = vector.broadcast %101 : vector<1x1x32xf32> to vector<1x8x32xf32>
      %103 = arith.addf %100, %102 : vector<1x8x32xf32>
      %c0_29 = arith.constant 0 : index
      %c0_30 = arith.constant 0 : index
      %c0_31 = arith.constant 0 : index
      %104 = vector.load %arg9[%c0_29, %c0_30, %c0_31] : memref<1x8x32xf32, #tpu.memory_space<vmem>>, vector<1x8x32xf32>
      tpu.vector_store %arg9[%c0_29, %c0_30, %c0_31], %103 {strides = array<i32>} : memref<1x8x32xf32, #tpu.memory_space<vmem>>, vector<1x8x32xf32>,
    } else {
    }
    %c1_i32 = arith.constant 1 : i32
    %21 = arith.cmpi eq, %arg1, %c1_i32 : i32
    %22 = arith.extui %21 : i1 to i32
    %c0_i32_8 = arith.constant 0 : i32
    %23 = arith.cmpi ne, %22, %c0_i32_8 : i32
    scf.if %23 {
      %c0_9 = arith.constant 0 : index
      %c0_10 = arith.constant 0 : index
      %c0_11 = arith.constant 0 : index
      %24 = vector.load %arg9[%c0_9, %c0_10, %c0_11] : memref<1x8x32xf32, #tpu.memory_space<vmem>>, vector<1x8x32xf32>
      %c0_12 = arith.constant 0 : index
      %c0_13 = arith.constant 0 : index
      %c0_14 = arith.constant 0 : index
      %25 = vector.load %arg8[%c0_12, %c0_13, %c0_14] : memref<1x8x32xf32, #tpu.memory_space<vmem>>, vector<1x8x32xf32>
      tpu.vector_store %arg8[%c0_12, %c0_13, %c0_14], %24 {strides = array<i32>} : memref<1x8x32xf32, #tpu.memory_space<vmem>>, vector<1x8x32xf32>,
    } else {
    }
    return
  }
  func.func @transform_0(%arg0: i32, %arg1: i32) -> (i32, i32, i32) {
    %c0_i32 = arith.constant 0 : i32
    %c0_i32_0 = arith.constant 0 : i32
    %c0_i32_1 = arith.constant 0 : i32
    return %arg0, %c0_i32, %c0_i32_0 : i32, i32, i32
  }
  func.func @transform_1(%arg0: i32, %arg1: i32) -> (i32, i32, i32) {
    %c0_i32 = arith.constant 0 : i32
    %c0_i32_0 = arith.constant 0 : i32
    %c0_i32_1 = arith.constant 0 : i32
    return %arg0, %c0_i32, %c0_i32_0 : i32, i32, i32
  }
  func.func @transform_2(%arg0: i32, %arg1: i32) -> (i32, i32, i32) {
    %c0_i32 = arith.constant 0 : i32
    %c0_i32_0 = arith.constant 0 : i32
    %c0_i32_1 = arith.constant 0 : i32
    return %arg0, %c0_i32, %c0_i32_0 : i32, i32, i32
  }
  func.func @transform_3(%arg0: i32, %arg1: i32) -> (i32, i32, i32) {
    %c0_i32 = arith.constant 0 : i32
    %c0_i32_0 = arith.constant 0 : i32
    %c0_i32_1 = arith.constant 0 : i32
    %c0_i32_2 = arith.constant 0 : i32
    return %c0_i32, %c0_i32_0, %c0_i32_1 : i32, i32, i32
  }
  func.func @transform_4(%arg0: i32, %arg1: i32) -> (i32, i32, i32) {
    %c0_i32 = arith.constant 0 : i32
    %c0_i32_0 = arith.constant 0 : i32
    %c0_i32_1 = arith.constant 0 : i32
    %c0_i32_2 = arith.constant 0 : i32
    return %c0_i32, %c0_i32_0, %c0_i32_1 : i32, i32, i32
  }
  func.func @transform_5(%arg0: i32, %arg1: i32) -> (i32, i32, i32) {
    %c0_i32 = arith.constant 0 : i32
    %c0_i32_0 = arith.constant 0 : i32
    %c0_i32_1 = arith.constant 0 : i32
    %c0_i32_2 = arith.constant 0 : i32
    return %c0_i32, %c0_i32_0, %c0_i32_1 : i32, i32, i32
  }
  func.func @transform_6(%arg0: i32, %arg1: i32) -> (i32, i32, i32) {
    %c0_i32 = arith.constant 0 : i32
    %c0_i32_0 = arith.constant 0 : i32
    %c0_i32_1 = arith.constant 0 : i32
    return %arg0, %c0_i32, %c0_i32_0 : i32, i32, i32
  }
}

</mosaic_0001>

<bundles_post_ra>
// kernel: sequential_blocks_forward.1
= control target key start
LH: loop header
LB: loop body
LE: loop exit
PB: predicated region body
PF: predicated region fallthrough
CT: control target
= control target key end

     0   :  { %s1632_s0 = inlined_call_operand.vmem [shape: f32[2,8,32], index: 0, kind: input, shape index: {}]   ;;  %s1633_s1 = inlined_call_operand.vmem [shape: f32[2,8,32], index: 1, kind: input, shape index: {}]   ;;  %s1634_s2 = inlined_call_operand.vmem [shape: f32[2,8,32], index: 2, kind: input, shape index: {}]   ;;  %s1635_s3 = inlined_call_operand.vmem [shape: bf16[2,32,128], index: 3, kind: input, shape index: {}]   ;;  %s1636_s4 = inlined_call_operand.vmem [shape: bf16[2,128,32], index: 4, kind: input, shape index: {}]   ;;  %s1637_s5 = inlined_call_operand.vmem [shape: f32[2,6,128], index: 5, kind: input, shape index: {}]   ;;  %s1638_s6 = inlined_call_operand.hbm [shape: f32[2,8,32], index: 6, kind: output, shape index: {}]  }
   0x1   :  { %1643 = sst [smem:[#allocation10_spill]] %s1635_s3 }
   0x2   :  { %11 = vsyncpa [#allocation4], 0 }
   0x3   :  { %13 = vsyncpa [#allocation4 + $0x1], 0  ;;  %s1261_s21 = smov 0   ;;  %s1263_s22 = smov 0  }
   0x4   :  { %s1265_s23 = smov 0   ;;  %s1267_s24 = smov 0  }
   0x5   :  { %s1269_s25 = smov 0   ;;  %s1271_s26 = smov 0  }
   0x6   :  { %s1273_s27 = smov 0   ;;  %s1275_s28 = smov 0  }
   0x7 LB: > { %1644 = sst [smem:[#allocation6_spill]] %s1214_s26  ;;  %s906_s29 = sadd.s32 4294967295, %s1222_s28   ;;  %s1222_s28 = sphi %s1275_s28, %s19_s28   ;;  %s1218_s27 = sphi %s1273_s27, %s1655_s27   ;;  %s1214_s26 = sphi %s1271_s26, %s1654_s26   ;;  %s1210_s25 = sphi %s1269_s25, %s1653_s25   ;;  %s1206_s24 = sphi %s1267_s24, %s1652_s24   ;;  %s1202_s23 = sphi %s1265_s23, %s1658_s23   ;;  %s1198_s22 = sphi %s1263_s22, %s1657_s22   ;;  %s1194_s21 = sphi %s1261_s21, %s1656_s21  }
   0x8   : > { %1645 = sst [smem:[#allocation7_spill]] %s1218_s27  ;;  %s907_s30 = sadd.s32 4294967294, %s1222_s28  }
   0x9   : > { %s28_s7 = sadd.s32 1, %s1214_s26  ;;  %s31_s8 = sadd.s32 1, %s1218_s27 }
   0xa   : > { %p29_p0 = scmp.ge.s32.totalorder %s28_s7, 2  ;;  %p189_p1 = scmp.ne.s32.totalorder %s1202_s23, %s1198_s22 }
   0xb   : > { %p190_p2 = scmp.eq.s32.totalorder %s906_s29, 3  ;;  %p195_p4 = scmp.ne.s32.totalorder %s1198_s22, %s1194_s21 }
   0xc   : > { %s1660_s7 = smov (%p29_p0, %s28_s7), 0  ;;  %s1662_s8 = smov (!%p29_p0, %s31_s8), %s1218_s27 }
   0xd   : > { %1646 = sst [smem:[#allocation8_spill]] %s1660_s7  ;;  %p1310_p3 = por %p190_p2, %p189_p1 }
   0xe   : > { %p33_p5 = scmp.ge.s32.totalorder %s1662_s8, 2  ;;  %p196_p6 = scmp.eq.s32.totalorder %s907_s30, 3 }
   0xf   : > { %p910_p7 = scmp.ge.s32.totalorder %s1222_s28, 1  ;;  %p244_p8 = scmp.lt.s32.totalorder %s1222_s28, 5 }
  0x10   : > { %s1664_s8 = smov (%p33_p5, %s1662_s8), 0  ;;  %p1320_p9 = por %p196_p6, %p195_p4 }
  0x11   : > { %1648 = sst [smem:[#allocation9_spill]] %s1664_s8  ;;  %p245_p10 = pnand %p910_p7, %p244_p8 }
  0x12   : > { %s176_s11 = ssub.s32 %s1218_s27, %s1664_s8  ;;  %s179_s12 = sadd.s32 1, %s1202_s23 }
  0x13   : > { %p177_p11 = scmp.eq.s32.totalorder %s176_s11, 0  ;;  %248 = sbr.rel (%p245_p10) target bundleno = 2763 (0xacb), region = 44 }
  0x14   : > { %s1639_s14 = sand.u32 (!%p245_p10), 1, %s1198_s22   ;;  %p281_p12 = scmp.lt.s32.totalorder (!%p245_p10), %s1210_s25, 1 }
  0x15   : > { %s1328_s13 = scalar_select %p177_p11, %s1202_s23, %s179_s12  }
  0x16   : > { %s1334_s15 = sshll.u32 (!%p245_p10), %s1639_s14, 3  ;;  %s1013_s16 = sshll.u32 (!%p245_p10), %s1206_s24, 4 }
  0x17   : > { %s1650_s3 = sld [smem:[#allocation10_spill]] (!%p245_p10)  ;;  %s1018_s30 = sshll.u32 (!%p245_p10), %s1206_s24, 6 }
  0x18   : > { %s282_s20 = scalar_select %p281_p12, %s1210_s25, 1 }
  0x19   : > { %s1375_s26 = scalar_lea.vmem %s1636_s4, %s1018_s30  ;;  %s280_s30 = scalar_lea.vmem [#allocation3], %s1334_s15 }
  0x1a   : > { %s1351_s29 = sshll.u32 %s282_s20, 3  ;;  %v1378_v8 = vld [vmem:[%s1375_s26] sm:$0xf]  ;;  %v1384_v10 = vld [vmem:[%s1375_s26] sm:$0xf0]  ;;  %p920_p13 = scmp.ne.s32.totalorder %s1206_s24, 0 }
  0x1b   : > { %s288_s14 = scalar_lea.vmem %s1633_s1, %s1351_s29  ;;  %s292_s8 = scalar_lea.vmem %s1634_s2, %s1351_s29  ;;  %v1381_v9 = vld [vmem:[%s1375_s26] sm:$0xf]  ;;  %v1387_v11 = vld [vmem:[%s1375_s26] sm:$0xf0]  ;;  %v1390_v12 = vld [vmem:[%s1375_s26 + $0x8] sm:$0xf] }
  0x1c   : > { %v1393_v13 = vld [vmem:[%s1375_s26 + $0x8] sm:$0xf]  ;;  %v1396_v14 = vld [vmem:[%s1375_s26 + $0x8] sm:$0xf0]  ;;  %v1402_v16 = vld [vmem:[%s1375_s26 + $0x10] sm:$0xf] }
  0x1d   : > { %s296_s19 = scalar_lea.vmem %s1650_s3, %s1013_s16  ;;  %s284_s16 = scalar_lea.vmem %s1632_s0, %s1351_s29  ;;  %v1399_v15 = vld [vmem:[%s1375_s26 + $0x8] sm:$0xf0]  ;;  %v1405_v17 = vld [vmem:[%s1375_s26 + $0x10] sm:$0xf]  ;;  %v1408_v18 = vld [vmem:[%s1375_s26 + $0x10] sm:$0xf0] }
  0x1e   : > { %v1341_v0 = vld [vmem:[%s296_s19] sm:$0xf]  ;;  %v1345_v2 = vld [vmem:[%s296_s19] sm:$0xf0]  ;;  %v1349_v4 = vld [vmem:[%s296_s19 + $0x8] sm:$0xf] }
  0x1f   : > { %v1343_v1 = vld [vmem:[%s296_s19] sm:$0xf]  ;;  %v1347_v3 = vld [vmem:[%s296_s19] sm:$0xf0]  ;;  %v1353_v5 = vld [vmem:[%s296_s19 + $0x8] sm:$0xf] }
  0x20   : > { %v1355_v6 = vld [vmem:[%s296_s19 + $0x8] sm:$0xf0]  ;;  %v1411_v19 = vld [vmem:[%s1375_s26 + $0x10] sm:$0xf0]  ;;  %v1414_v20 = vld [vmem:[%s1375_s26 + $0x18] sm:$0xf] }
  0x21   : > { %v1366_v7 = vld [vmem:[%s296_s19 + $0x8] sm:$0xf0]  ;;  %v1417_v21 = vld [vmem:[%s1375_s26 + $0x18] sm:$0xf]  ;;  %v1420_v22 = vld [vmem:[%s1375_s26 + $0x18] sm:$0xf0] }
  0x22   : > { %v1423_v23 = vld [vmem:[%s1375_s26 + $0x18] sm:$0xf0]  ;;  %v1426_v24 = vld [vmem:[%s1375_s26 + $0x20] sm:$0xf]  ;;  %v1432_v26 = vld [vmem:[%s1375_s26 + $0x20] sm:$0xf0] }
  0x23   : > { %v1429_v25 = vld [vmem:[%s1375_s26 + $0x20] sm:$0xf]  ;;  %v1435_v27 = vld [vmem:[%s1375_s26 + $0x20] sm:$0xf0]  ;;  %v1438_v28 = vld [vmem:[%s1375_s26 + $0x28] sm:$0xf] }
  0x24   : > { %v1441_v29 = vld [vmem:[%s1375_s26 + $0x28] sm:$0xf]  ;;  %v1444_v30 = vld [vmem:[%s1375_s26 + $0x28] sm:$0xf0]  ;;  %v1450_v32 = vld [vmem:[%s1375_s26 + $0x30] sm:$0xf] }
  0x25   : > { %v1447_v31 = vld [vmem:[%s1375_s26 + $0x28] sm:$0xf0]  ;;  %v1453_v33 = vld [vmem:[%s1375_s26 + $0x30] sm:$0xf]  ;;  %v1456_v34 = vld [vmem:[%s1375_s26 + $0x30] sm:$0xf0] }
  0x26   : > { %v1459_v35 = vld [vmem:[%s1375_s26 + $0x30] sm:$0xf0]  ;;  %v1462_v36 = vld [vmem:[%s1375_s26 + $0x38] sm:$0xf]  ;;  %v1468_v38 = vld [vmem:[%s1375_s26 + $0x38] sm:$0xf0] }
  0x27   : > { %v1465_v37 = vld [vmem:[%s1375_s26 + $0x38] sm:$0xf]  ;;  %v1471_v39 = vld [vmem:[%s1375_s26 + $0x38] sm:$0xf0]  ;;  %s919_s3 = sshll.u32 %s1206_s24, 3  ;;  %326 = sbr.rel (%p920_p13) target bundleno = 1388 (0x56c), region = 48 }
  0x28   : > { %s321_s19 = scalar_lea.vmem %s1637_s5, %s919_s3 }
  0x29   : > { %v1477_v40 = vld [vmem:[%s321_s19] sm:$0x3f] }
  0x2c   : > { %v328_v41 = vld [vmem:[%s288_s14] sm:$0xff]  ;;  %vm333_vm0 = vcmask 261120   ;;  %vm353_vm1 = vcmask 64512   ;;  %vm383_vm2 = vcmask 1043456  }
  0x2d   : > { %v327_v42 = vld [vmem:[%s284_s16] sm:$0xff]  ;;  %v332_v43 = vpack.c.bf16 %v328_v41, %v328_v41 }
  0x2e   : > { %v330_v45 = vmul.f32 0.17677669, %v327_v42  ;;  %v329_v55 = vld [vmem:[%s292_s8] sm:$0xff] }
  0x2f   : > { %v338_v44 = vsel %vm333_vm0, %v332_v43, 0  ;;  %v379_v56 = vpack.c.bf16 %v329_v55, %v329_v55 }
  0x30   : > { %347 = vmatpush.bf16.xpose.msra.mxu0 %v338_v44  ;;  %v331_v46 = vpack.c.bf16 %v330_v45, %v330_v45 }
  0x31   : > { %v385_v57 = vsel %vm383_vm2, %v379_v56, 0 }
  0x32   : > { %394 = vmatpush.bf16.msra.mxu1 %v385_v57 }
  0x37   : > { %921 = vmatmul.msk.bf16.vlgmr.msra.gmra.mxu0 %vm333_vm0, %v331_v46 }
  0xb4   : > { %v349_v47 = vpop.f32.mrf.mxu0 }
  0xb5   : > { %v354_v48 = vsel %vm353_vm1, %v349_v47, -inf }
  0xb6   : > { %355 = vmax.xlane.f32.xlu0 %v354_v48 }
  0xbc   : > { %v351_v49 = vpop.f32.mrf.mxu0 }
 0x129   : > { %v356_v50 = vpop.xlane.xlu0 %355 }
 0x12a   : > { %v357_v51 = vsub.f32 %v349_v47, %v356_v50 }
 0x12c   : > { %v358_v52 = vmul.f32 1.442695, %v357_v51 }
 0x12e   : > { %1108 = vpow2.f32 %v358_v52 }
 0x134   : > { %v1109_v53 = vpop.eup %1108 }
 0x135   : > { %v360_v54 = vsel %vm353_vm1, %v1109_v53, 0.0 }
 0x136   : > { %361 = vadd.xlane.f32.xlu0 %v360_v54  ;;  %v1224_v54 = vmov 32.0  }
 0x1a9   : > { %v362_v58 = vpop.xlane.xlu0 %361 }
 0x1aa   : > { %1110 = vrcp.f32 %v362_v58  ;;  %v374_v62 = vand.u32 2147483648, %v362_v58  ;;  %v372_v41 = vand.u32 2147483647, %v362_v58  ;;  %vm368_vm4 = vweird.f32 %v362_v58 }
 0x1ab   : > { %1112 = vrcp.f32 %v1224_v54 }
 0x1ac   : > { %v375_v44 = vor.u32 1.1754944e-38, %v374_v62  ;;  %vm373_vm6 = vcmp.eq.f32.partialorder %v372_v41, 8.507059e+37  ;;  %v930_v41 = vor.u32 %v1366_v7, %v1353_v5  ;;  %v955_v5 = vor.u32 %v1447_v31, %v1441_v29 }
 0x1ad   : > { %v429_v29 = vperm.slane %v1477_v40, 2  ;;  %v431_v31 = vperm.slane %v1477_v40, 3 }
 0x1ae   : > { %456 = vmatpush.bf16.msra.mxu2 %v930_v41 }
 0x1b0   : > { %v1111_v59 = vpop.eup %1110 }
 0x1b1   : > { %v364_v60 = vmul.f32 %v1111_v59, %v362_v58  ;;  %vm369_vm3 = vweird.f32 %v1111_v59  ;;  %v1113_v55 = vpop.eup %1112 }
 0x1b2   : > { %vm370_vm5 = vmor %vm368_vm4, %vm369_vm3  ;;  %v404_v56 = vmul.f32 32.0, %v1113_v55  ;;  %vm408_vm7 = vweird.f32 %v1113_v55 }
 0x1b3   : > { %v365_v61 = vsub.f32 1.0, %v364_v60 }
 0x1b4   : > { %v405_v57 = vsub.f32 1.0, %v404_v56 }
 0x1b5   : > { %v366_v63 = vmul.f32 %v1111_v59, %v365_v61 }
 0x1b6   : > { %v406_v58 = vmul.f32 %v1113_v55, %v405_v57 }
 0x1b7   : > { %v367_v43 = vadd.f32 %v1111_v59, %v366_v63 }
 0x1b8   : > { %v407_v60 = vadd.f32 %v1113_v55, %v406_v58 }
 0x1b9   : > { %v371_v45 = vsel %vm370_vm5, %v1111_v59, %v367_v43  ;;  %v926_v43 = vor.u32 %v1347_v3, %v1343_v1  ;;  %v951_v1 = vor.u32 %v1435_v27, %v1429_v25 }
 0x1ba   : > { %v376_v46 = vsel %vm373_vm6, %v375_v44, %v371_v45  ;;  %v1502_v59 = vsel %vm408_vm7, %v1113_v55, %v407_v60  ;;  %v963_v44 = vor.u32 %v1471_v39, %v1465_v37  ;;  %v947_v37 = vor.u32 %v1423_v23, %v1417_v21 }
 0x1bb   : > { %v377_v47 = vmul.f32 %v1109_v53, %v376_v46  ;;  %457 = vmatpush.bf16.msra.mxu2 %v926_v43  ;;  %v465_v60 = vperm.slane %v1477_v40, 1 }
 0x1bc   : > { %514 = vmatpush.bf16.msra.mxu3 %v963_v44 }
 0x1bd   : > { %v378_v48 = vpack.c.bf16 %v377_v47, %v377_v47  ;;  %v959_v47 = vor.u32 %v1459_v35, %v1453_v33  ;;  %v943_v33 = vor.u32 %v1411_v19, %v1405_v17  ;;  %v939_v17 = vor.u32 %v1399_v15, %v1393_v13 }
 0x1be   : > { %v935_v19 = vor.u32 %v1387_v11, %v1381_v9 }
 0x1bf   : > { %922 = vmatmul.msk.bf16.vlgmr.msra.gmra.mxu1 %vm353_vm1, %v378_v48 }
 0x1c0   : > { %515 = vmatpush.bf16.msra.mxu3 %v959_v47 }
 0x1c4   : > { %516 = vmatpush.bf16.msra.mxu3 %v955_v5 }
 0x1c8   : > { %517 = vmatpush.bf16.msra.mxu3 %v951_v1 }
 0x1cc   : > { %518 = vmatpush.bf16.msra.mxu3 %v947_v37 }
 0x1d0   : > { %519 = vmatpush.bf16.msra.mxu3 %v943_v33 }
 0x1d4   : > { %520 = vmatpush.bf16.msra.mxu3 %v939_v17 }
 0x1d8   : > { %521 = vmatpush.bf16.msra.mxu3 %v935_v19 }
 0x23c   : > { %v396_v49 = vpop.f32.mrf.mxu1 }
 0x23d   : > { %v397_v50 = vadd.f32 %v396_v49, %v327_v42 }
 0x23f   : > { %v400_v51 = vsel %vm333_vm0, %v397_v50, 0.0 }
 0x240   : > { %401 = vadd.xlane.f32.xlu1 %v400_v51 }
 0x244   : > { %v398_v52 = vpop.f32.mrf.mxu1 }
 0x245   : > { %v434_v52 = vperm.slane %v1477_v40, 0 }
 0x2b3   : > { %v402_v53 = vpop.xlane.xlu1 %401 }
 0x2b4   : > { %v410_v61 = vmul.f32 %v1502_v59, %v402_v53 }
 0x2b6   : > { %v411_v62 = vsub.f32 %v397_v50, %v410_v61 }
 0x2b8   : > { %v412_v63 = vmul.f32 %v411_v62, %v411_v62 }
 0x2ba   : > { %v413_v42 = vsel %vm333_vm0, %v412_v63, 0.0 }
 0x2bb   : > { %414 = vadd.xlane.f32.xlu1 %v413_v42 }
 0x32e   : > { %v415_v45 = vpop.xlane.xlu1 %414 }
 0x32f   : > { %v416_v46 = vmul.f32 %v415_v45, %v1502_v59 }
 0x331   : > { %v417_v48 = vadd.f32 1e-05, %v416_v46 }
 0x333   : > { %1114 = vrsqrt.f32 %v417_v48  ;;  %vm424_vm9 = vweird.f32 %v417_v48 }
 0x339   : > { %v1115_v3 = vpop.eup %1114 }
 0x33a   : > { %v419_v7 = vmul.f32 %v1115_v3, %v417_v48  ;;  %vm425_vm8 = vweird.f32 %v1115_v3 }
 0x33b   : > { %vm426_vm10 = vmor %vm424_vm9, %vm425_vm8 }
 0x33c   : > { %v420_v39 = vmul.f32 %v1115_v3, %v419_v7  ;;  %v550_v7 = vperm.slane %v1477_v40, 4 }
 0x33e   : > { %v421_v49 = vmul.f32 0.5, %v420_v39  ;;  %v552_v39 = vperm.slane %v1477_v40, 5 }
 0x340   : > { %v422_v35 = vsub.f32 1.5, %v421_v49 }
 0x342   : > { %v423_v50 = vmul.f32 %v1115_v3, %v422_v35 }
 0x344   : > { %v427_v25 = vsel %vm426_vm10, %v1115_v3, %v423_v50 }
 0x345   : > { %v428_v27 = vmul.f32 %v427_v25, %v411_v62 }
 0x347   : > { %v430_v51 = vmul.f32 %v429_v29, %v428_v27 }
 0x349   : > { %v432_v21 = vadd.f32 %v431_v31, %v430_v51 }
 0x34b   : > { %v433_v23 = vpack.c.bf16 %v432_v21, %v432_v21 }
 0x34d   : > { %931 = vmatmul.msk.bf16.vlgmr.msra.gmra.mxu2 %vm333_vm0, %v433_v23 }
 0x3d0   : > { %v459_v54 = vpop.f32.mrf.mxu2 }
 0x3d1   : > { %v460_v55 = vadd.f32 %v459_v54, %v434_v52 }
 0x3d3   : > { %v463_v56 = vmax.f32 %v460_v55, 0.0 }
 0x3d5   : > { %v464_v57 = vpack.c.bf16 %v463_v56, %v463_v56 }
 0x3d7   : > { %522 = vmatmul.bf16.vlgmr.msra.gmra.mxu3 %v464_v57 }
 0x3d8   : > { %v461_v58 = vpop.f32.mrf.mxu2 }
 0x45a   : > { %v523_v53 = vpop.f32.mrf.mxu3 }
 0x45b   : > { %v524_v61 = vadd.f32 %v523_v53, %v465_v60 }
 0x45d   : > { %v527_v62 = vadd.f32 %v524_v61, %v432_v21 }
 0x45f   : > { %v528_v13 = vsel %vm333_vm0, %v527_v62, 0.0 }
 0x460   : > { %529 = vadd.xlane.f32.xlu2 %v528_v13 }
 0x462   : > { %v525_v15 = vpop.f32.mrf.mxu3 }
 0x4d3   : > { %v530_v63 = vpop.xlane.xlu2 %529 }
 0x4d4   : > { %v531_v9 = vmul.f32 %v530_v63, %v1502_v59 }
 0x4d6   : > { %v532_v11 = vsub.f32 %v527_v62, %v531_v9 }
 0x4d8   : > { %v533_v42 = vmul.f32 %v532_v11, %v532_v11 }
 0x4da   : > { %v534_v41 = vsel %vm333_vm0, %v533_v42, 0.0 }
 0x4db   : > { %535 = vadd.xlane.f32.xlu2 %v534_v41 }
 0x54e   : > { %v536_v43 = vpop.xlane.xlu2 %535 }
 0x54f   : > { %v537_v44 = vmul.f32 %v536_v43, %v1502_v59 }
 0x551   : > { %v538_v45 = vadd.f32 1e-05, %v537_v44 }
 0x553   : > { %1116 = vrsqrt.f32 %v538_v45  ;;  %vm545_vm12 = vweird.f32 %v538_v45 }
 0x559   : > { %v1117_v46 = vpop.eup %1116 }
 0x55a   : > { %v540_v47 = vmul.f32 %v1117_v46, %v538_v45  ;;  %vm546_vm11 = vweird.f32 %v1117_v46 }
 0x55b   : > { %vm547_vm13 = vmor %vm545_vm12, %vm546_vm11 }
 0x55c   : > { %v541_v48 = vmul.f32 %v1117_v46, %v540_v47 }
 0x55e   : > { %v542_v5 = vmul.f32 0.5, %v541_v48 }
 0x560   : > { %v543_v1 = vsub.f32 1.5, %v542_v5 }
 0x562   : > { %v544_v3 = vmul.f32 %v1117_v46, %v543_v1 }
 0x564   : > { %v548_v37 = vsel %vm547_vm13, %v1117_v46, %v544_v3 }
 0x565   : > { %v549_v49 = vmul.f32 %v548_v37, %v532_v11 }
 0x567   : > { %v551_v33 = vmul.f32 %v550_v7, %v549_v49 }
 0x569   : > { %v553_v35 = vadd.f32 %v552_v39, %v551_v33 }
 0x56b   : > { %554 = vst.msk [vmem:[#allocation2] sm:$0xff] %vm333_vm0, %v553_v35 }
 0x56c PF: > { %p964_p0 = scmp.le.s32.totalorder %s1206_s24, 0 }
 0x56e   : > { %558 = sbr.rel (%p964_p0) target bundleno = 2739 (0xab3), region = 52 }
 0x573   : > { %v559_v59 = vld [vmem:[#allocation2] sm:$0xff]  ;;  %vm563_vm14 = vcmask 261120   ;;  %vm583_vm15 = vcmask 64512   ;;  %vm612_vm0 = vcmask 1043456   ;;  %v1225_v46 = vmov 32.0  }
 0x574   : > { %v562_v50 = vpack.c.bf16 %v559_v59, %v559_v59  ;;  %v560_v25 = vmul.f32 0.17677669, %v559_v59 }
 0x576   : > { %v568_v29 = vsel %vm563_vm14, %v562_v50, 0  ;;  %v561_v27 = vpack.c.bf16 %v560_v25, %v560_v25  ;;  %v613_v55 = vsel %vm612_vm0, %v562_v50, 0  ;;  %v970_v50 = vor.u32 %v1345_v2, %v1341_v0 }
 0x577   : > { %577 = vmatpush.bf16.xpose.msra.mxu0 %v568_v29  ;;  %622 = vmatpush.bf16.msra.mxu1 %v613_v55  ;;  %v1007_v29 = vor.u32 %v1468_v38, %v1462_v36  ;;  %v995_v0 = vor.u32 %v1432_v26, %v1426_v24  ;;  %v991_v36 = vor.u32 %v1420_v22, %v1414_v20 }
 0x579   : > { %742 = vmatpush.bf16.msra.mxu3 %v1007_v29 }
 0x57e   : > { %965 = vmatmul.msk.bf16.vlgmr.msra.gmra.mxu0 %vm563_vm14, %v561_v27 }
 0x5fb   : > { %v579_v31 = vpop.f32.mrf.mxu0 }
 0x5fc   : > { %v584_v51 = vsel %vm583_vm15, %v579_v31, -inf }
 0x5fd   : > { %585 = vmax.xlane.f32.xlu0 %v584_v51 }
 0x603   : > { %v581_v21 = vpop.f32.mrf.mxu0 }
 0x670   : > { %v586_v23 = vpop.xlane.xlu0 %585 }
 0x671   : > { %v587_v17 = vsub.f32 %v579_v31, %v586_v23  ;;  %v1003_v31 = vor.u32 %v1456_v34, %v1450_v32  ;;  %v987_v32 = vor.u32 %v1408_v18, %v1402_v16  ;;  %v983_v16 = vor.u32 %v1396_v14, %v1390_v12 }
 0x672   : > { %v979_v18 = vor.u32 %v1384_v10, %v1378_v8 }
 0x673   : > { %v588_v19 = vmul.f32 1.442695, %v587_v17  ;;  %743 = vmatpush.bf16.msra.mxu3 %v1003_v31 }
 0x675   : > { %1118 = vpow2.f32 %v588_v19  ;;  %v662_v19 = vperm.slane %v1477_v40, 0 }
 0x67b   : > { %v1119_v52 = vpop.eup %1118 }
 0x67c   : > { %v590_v54 = vsel %vm583_vm15, %v1119_v52, 0.0 }
 0x67d   : > { %591 = vadd.xlane.f32.xlu0 %v590_v54 }
 0x6f0   : > { %v592_v56 = vpop.xlane.xlu0 %591 }
 0x6f1   : > { %1120 = vrcp.f32 %v592_v56  ;;  %v604_v53 = vand.u32 2147483648, %v592_v56  ;;  %v602_v62 = vand.u32 2147483647, %v592_v56  ;;  %vm598_vm2 = vweird.f32 %v592_v56 }
 0x6f2   : > { %1122 = vrcp.f32 %v1225_v46 }
 0x6f3   : > { %v605_v15 = vor.u32 1.1754944e-38, %v604_v53  ;;  %vm603_vm4 = vcmp.eq.f32.partialorder %v602_v62, 8.507059e+37 }
 0x6f7   : > { %v1121_v57 = vpop.eup %1120 }
 0x6f8   : > { %v594_v58 = vmul.f32 %v1121_v57, %v592_v56  ;;  %vm599_vm1 = vweird.f32 %v1121_v57  ;;  %v1123_v47 = vpop.eup %1122 }
 0x6f9   : > { %vm600_vm3 = vmor %vm598_vm2, %vm599_vm1  ;;  %v632_v48 = vmul.f32 32.0, %v1123_v47  ;;  %vm636_vm5 = vweird.f32 %v1123_v47 }
 0x6fa   : > { %v595_v60 = vsub.f32 1.0, %v594_v58  ;;  %v693_v58 = vperm.slane %v1477_v40, 1 }
 0x6fb   : > { %v633_v5 = vsub.f32 1.0, %v632_v48 }
 0x6fc   : > { %v596_v61 = vmul.f32 %v1121_v57, %v595_v60 }
 0x6fd   : > { %v634_v1 = vmul.f32 %v1123_v47, %v633_v5  ;;  %v780_v5 = vperm.slane %v1477_v40, 5 }
 0x6fe   : > { %v597_v13 = vadd.f32 %v1121_v57, %v596_v61 }
 0x6ff   : > { %v635_v3 = vadd.f32 %v1123_v47, %v634_v1 }
 0x700   : > { %v601_v63 = vsel %vm600_vm3, %v1121_v57, %v597_v13 }
 0x701   : > { %v606_v9 = vsel %vm603_vm4, %v605_v15, %v601_v63  ;;  %v1546_v7 = vsel %vm636_vm5, %v1123_v47, %v635_v3  ;;  %v778_v47 = vperm.slane %v1477_v40, 4 }
 0x702   : > { %v607_v11 = vmul.f32 %v1119_v52, %v606_v9 }
 0x704   : > { %v608_v42 = vpack.c.bf16 %v607_v11, %v607_v11 }
 0x706   : > { %966 = vmatmul.msk.bf16.vlgmr.msra.gmra.mxu1 %vm583_vm15, %v608_v42 }
 0x783   : > { %v624_v41 = vpop.f32.mrf.mxu1 }
 0x784   : > { %v625_v43 = vadd.f32 %v624_v41, %v559_v59  ;;  %v974_v59 = vor.u32 %v1355_v6, %v1349_v4  ;;  %v999_v4 = vor.u32 %v1444_v30, %v1438_v28  ;;  %v657_v28 = vperm.slane %v1477_v40, 2 }
 0x785   : > { %v659_v30 = vperm.slane %v1477_v40, 3 }
 0x786   : > { %v628_v44 = vsel %vm563_vm14, %v625_v43, 0.0  ;;  %684 = vmatpush.bf16.msra.mxu2 %v974_v59  ;;  %744 = vmatpush.bf16.msra.mxu3 %v999_v4 }
 0x787   : > { %629 = vadd.xlane.f32.xlu1 %v628_v44 }
 0x78a   : > { %685 = vmatpush.bf16.msra.mxu2 %v970_v50  ;;  %745 = vmatpush.bf16.msra.mxu3 %v995_v0 }
 0x78b   : > { %v626_v45 = vpop.f32.mrf.mxu1 }
 0x78e   : > { %746 = vmatpush.bf16.msra.mxu3 %v991_v36 }
 0x792   : > { %747 = vmatpush.bf16.msra.mxu3 %v987_v32 }
 0x796   : > { %748 = vmatpush.bf16.msra.mxu3 %v983_v16 }
 0x79a   : > { %749 = vmatpush.bf16.msra.mxu3 %v979_v18 }
 0x7fa   : > { %v630_v37 = vpop.xlane.xlu1 %629 }
 0x7fb   : > { %v638_v39 = vmul.f32 %v1546_v7, %v630_v37 }
 0x7fd   : > { %v639_v49 = vsub.f32 %v625_v43, %v638_v39 }
 0x7ff   : > { %v640_v33 = vmul.f32 %v639_v49, %v639_v49 }
 0x801   : > { %v641_v35 = vsel %vm563_vm14, %v640_v33, 0.0 }
 0x802   : > { %642 = vadd.xlane.f32.xlu1 %v641_v35 }
 0x875   : > { %v643_v25 = vpop.xlane.xlu1 %642 }
 0x876   : > { %v644_v27 = vmul.f32 %v643_v25, %v1546_v7 }
 0x878   : > { %v645_v51 = vadd.f32 1e-05, %v644_v27 }
 0x87a   : > { %1124 = vrsqrt.f32 %v645_v51  ;;  %vm652_vm7 = vweird.f32 %v645_v51 }
 0x880   : > { %v1125_v2 = vpop.eup %1124 }
 0x881   : > { %v647_v6 = vmul.f32 %v1125_v2, %v645_v51  ;;  %vm653_vm6 = vweird.f32 %v1125_v2 }
 0x882   : > { %vm654_vm8 = vmor %vm652_vm7, %vm653_vm6 }
 0x883   : > { %v648_v38 = vmul.f32 %v1125_v2, %v647_v6 }
 0x885   : > { %v649_v21 = vmul.f32 0.5, %v648_v38 }
 0x887   : > { %v650_v34 = vsub.f32 1.5, %v649_v21 }
 0x889   : > { %v651_v23 = vmul.f32 %v1125_v2, %v650_v34 }
 0x88b   : > { %v655_v24 = vsel %vm654_vm8, %v1125_v2, %v651_v23 }
 0x88c   : > { %v656_v26 = vmul.f32 %v655_v24, %v639_v49 }
 0x88e   : > { %v658_v17 = vmul.f32 %v657_v28, %v656_v26 }
 0x890   : > { %v660_v20 = vadd.f32 %v659_v30, %v658_v17 }
 0x892   : > { %v661_v22 = vpack.c.bf16 %v660_v20, %v660_v20 }
 0x894   : > { %975 = vmatmul.msk.bf16.vlgmr.msra.gmra.mxu2 %vm563_vm14, %v661_v22 }
 0x917   : > { %v687_v52 = vpop.f32.mrf.mxu2 }
 0x918   : > { %v688_v54 = vadd.f32 %v687_v52, %v662_v19 }
 0x91a   : > { %v691_v55 = vmax.f32 %v688_v54, 0.0 }
 0x91c   : > { %v692_v56 = vpack.c.bf16 %v691_v55, %v691_v55 }
 0x91e   : > { %750 = vmatmul.bf16.vlgmr.msra.gmra.mxu3 %v692_v56 }
 0x91f   : > { %v689_v57 = vpop.f32.mrf.mxu2 }
 0x9a1   : > { %v751_v60 = vpop.f32.mrf.mxu3 }
 0x9a2   : > { %v752_v53 = vadd.f32 %v751_v60, %v693_v58 }
 0x9a4   : > { %v755_v61 = vadd.f32 %v752_v53, %v660_v20 }
 0x9a6   : > { %v756_v12 = vsel %vm563_vm14, %v755_v61, 0.0 }
 0x9a7   : > { %757 = vadd.xlane.f32.xlu2 %v756_v12 }
 0x9a9   : > { %v753_v14 = vpop.f32.mrf.mxu3 }
 0xa1a   : > { %v758_v62 = vpop.xlane.xlu2 %757 }
 0xa1b   : > { %v759_v8 = vmul.f32 %v758_v62, %v1546_v7 }
 0xa1d   : > { %v760_v10 = vsub.f32 %v755_v61, %v759_v8 }
 0xa1f   : > { %v761_v13 = vmul.f32 %v760_v10, %v760_v10 }
 0xa21   : > { %v762_v15 = vsel %vm563_vm14, %v761_v13, 0.0 }
 0xa22   : > { %763 = vadd.xlane.f32.xlu2 %v762_v15 }
 0xa95   : > { %v764_v63 = vpop.xlane.xlu2 %763 }
 0xa96   : > { %v765_v9 = vmul.f32 %v764_v63, %v1546_v7 }
 0xa98   : > { %v766_v11 = vadd.f32 1e-05, %v765_v9 }
 0xa9a   : > { %1126 = vrsqrt.f32 %v766_v11  ;;  %vm773_vm10 = vweird.f32 %v766_v11 }
 0xaa0   : > { %v1127_v42 = vpop.eup %1126 }
 0xaa1   : > { %v768_v41 = vmul.f32 %v1127_v42, %v766_v11  ;;  %vm774_vm9 = vweird.f32 %v1127_v42 }
 0xaa2   : > { %vm775_vm11 = vmor %vm773_vm10, %vm774_vm9 }
 0xaa3   : > { %v769_v43 = vmul.f32 %v1127_v42, %v768_v41 }
 0xaa5   : > { %v770_v44 = vmul.f32 0.5, %v769_v43 }
 0xaa7   : > { %v771_v45 = vsub.f32 1.5, %v770_v44 }
 0xaa9   : > { %v772_v46 = vmul.f32 %v1127_v42, %v771_v45 }
 0xaab   : > { %v776_v48 = vsel %vm775_vm11, %v1127_v42, %v772_v46 }
 0xaac   : > { %v777_v1 = vmul.f32 %v776_v48, %v760_v10 }
 0xaae   : > { %v779_v3 = vmul.f32 %v778_v47, %v777_v1 }
 0xab0   : > { %v781_v37 = vadd.f32 %v780_v5, %v779_v3 }
 0xab2   : > { %782 = vst.msk [vmem:[#allocation2] sm:$0xff] %vm563_vm14, %v781_v37 }
 0xab3 PF: > { %p1008_p1 = scmp.ne.s32.totalorder %s1206_s24, 1 }
 0xab5   : > { %786 = sbr.rel (%p1008_p1) target bundleno = 2748 (0xabc), region = 56 }
 0xaba   : > { %v787_v7 = vld [vmem:[#allocation2] sm:$0xff]  ;;  %vm788_vm12 = vcmask 261120  }
 0xabb   : > { %789 = vst.msk [vmem:[%s280_s30] sm:$0xff] %vm788_vm12, %v787_v7 }
 0xabc PF: > { %s1010_s8 = sshll.u32 %s1210_s25, 3  ;;  %s803_s3 = sshll.u32 %s280_s30, 4  ;;  %s804_s3 = int_to_ptr.vmem [resolvable:$true] %s803_s3 }
 0xabd   : > { %s801_s20 = scalar_lea.hbm %s1638_s6, %s1010_s8  ;;  %s1651_s27 = sand.u32 1, %s1198_s22  }
 0xabe   : > { %s805_s24 = sshll.u32 %s801_s20, 4  ;;  %s791_s7 = scalar_lea.sflag [#allocation4], %s1651_s27  ;;  %s806_s24 = int_to_ptr.hbm [resolvable:$true] %s805_s24 }
 0xabf   : > { %s1142_s19 = sshra.s32 %s806_s24, 4  ;;  %s1148_s26 = scalar_lea.hbm %s1638_s6, 16  ;;  %s1143_s19 = int_to_ptr.hbm [resolvable:$true] %s1142_s19 }
 0xac0   : > { %s1144_s11 = scalar_lea.hbm %s1143_s19, 8  ;;  %p1149_p6 = scmp.lt.s32.totalorder %s1143_s19, %s1638_s6 }
 0xac1   : > { %p1145_p2 = scmp.ne.s32.totalorder %s1143_s19, %s1144_s11  ;;  %p1150_p7 = scmp.lt.s32.totalorder %s1148_s26, %s1144_s11 }
 0xac3   : > { %p1146_p4 = pnand %p1145_p2, %p1310_p3  ;;  %p1151_p8 = por %p1150_p7, %p1149_p6 }
 0xac5   : > { %p1147_p5 = pneg %p1146_p4 }
 0xac7   : > { %p1152_p10 = pnand %p1151_p8, %p1147_p5 }
 0xac9   : > { %1155 = shalt.err (!%p1152_p10)
}
 0xaca   : > { %1035 = dma.vmem_to_hbm [thread:$0]  (%p1310_p3), %s804_s3, 128, %s806_s24, %s791_s7  }
 0xacb PF: > { %p1041_p11 = scmp.ge.s32.totalorder %s1222_s28, 2  ;;  %s817_s15 = sand.u32 1, %s1194_s21  }
 0xacc   : > { %s818_s30 = scalar_lea.sflag [#allocation4], %s817_s15 }
 0xacd   : > { %p1038_p12 = pnand %p1041_p11, %p1320_p9 }
 0xacf   : > { %p1039_p13 = pneg %p1038_p12 }
 0xad1   : > { %1189 = dma.done.wait (%p1039_p13), %s818_s30, 128  }
 0xad2   : > { %1191 = vsyncadd (%p1039_p13), %s818_s30, 4294967168  ;;  %s19_s28 = sadd.s32 1, %s1222_s28   ;;  %s1652_s24 = sld [smem:[#allocation6_spill]] }
 0xad3   : > { %p16_p0 = scmp.ge.s32.totalorder %s19_s28, 6   ;;  %s1653_s25 = sld [smem:[#allocation7_spill]] }
 0xad4   : > { %s1654_s26 = sld [smem:[#allocation8_spill]]  ;;  %s1656_s21 = smov %s1198_s22 }
 0xad5   : > { %s1655_s27 = sld [smem:[#allocation9_spill]]  ;;  %s1657_s22 = smov %s1202_s23 }
 0xad6   : > { %s1658_s23 = smov %s1328_s13  ;;  %18 = sbr.rel (!%p16_p0) target bundleno = 7 (0x7), region = 100 }
 0xadb   :  { %824 = vsyncpa [#allocation4], 1 }
 0xadc   :  { %826 = vsyncpa [#allocation4 + $0x1], 1 }

</bundles_post_ra>
